<compile_context>
chip_gen: v6e
topology: v6e:2x2x1
jax: 0.10.0
libtpu: 0.0.40
codegen_flags: <defaults>
</compile_context>

<pallas_src>
import functools

import jax
import jax.numpy as jnp
from jax import lax
from jax.experimental import pallas as pl
from jax.experimental.pallas import tpu as pltpu
import numpy as np


def _gcc_spatial_kernel(*refs, has_cam, n_ch):
    """Whole forward pass, fully resident in VMEM (grid-less).

    refs (has_cam=True):
      x3_ref   : (B, sz_FC1, 2)   x reshaped so the pooled pair is the last dim
      cam_ref  : (B, sz_cam)
      xr_ref   : (B, C)
      w12_ref  : (sz_FC1, sz_ex)  W1^T @ W2a^T  (FC1 folded into FC2)
      wcam_ref : (sz_cam, sz_ex)  W2b^T
      b_ref    : (1, sz_ex)       b1 @ W2a^T + b2
      e_ref    : (C, C*sz_ex)     channel-expansion (repeat) matrix
      out_ref  : (B, C*sz_ex)
    """
    if has_cam:
        x3_ref, cam_ref, xr_ref, w12_ref, wcam_ref, b_ref, e_ref, out_ref = refs
    else:
        x3_ref, xr_ref, w12_ref, b_ref, e_ref, out_ref = refs

    # --- max_pool2d((1,2),(1,2)) + flatten: pairwise max over trailing dim ----
    pooled = jnp.max(x3_ref[...], axis=-1)                          # (B, sz_FC1)

    # --- fused FC1 + FC2 (no nonlinearity between them; bias pre-folded) ------
    h2 = jnp.dot(pooled, w12_ref[...], preferred_element_type=jnp.float32)
    if has_cam:
        h2 = h2 + jnp.dot(cam_ref[...], wcam_ref[...],
                          preferred_element_type=jnp.float32)
    h2 = h2 + b_ref[...]                                            # (B, sz_ex)

    # --- torch.layer_norm(h2, [B, sz_ex]): whole-tensor stats, no affine, eps=1e-5
    mean = jnp.mean(h2)
    var = jnp.mean(jnp.square(h2 - mean))
    hn = (h2 - mean) * lax.rsqrt(var + 1e-5)

    # --- softmax over last dim.  Exact reciprocal on purpose: the kernel is
    #     overhead-bound, approx=True saves nothing and risks the tolerance. ---
    m = jnp.max(hn, axis=-1, keepdims=True)
    e = jnp.exp(hn - m)
    p = e * pl.reciprocal(jnp.sum(e, axis=-1, keepdims=True))       # (B, sz_ex)

    # --- bmm(x_ref (B,C,1), p (B,1,sz_ex)) emitted as a lane-oriented 2-D slab:
    #     out[b, c*sz_ex + e] = x_ref[b, c] * p[b, e].
    #     xr @ E repeats each channel sz_ex times (E hoisted, built once). ------
    xr_exp = jnp.dot(xr_ref[...], e_ref[...],
                     preferred_element_type=jnp.float32)            # (B, C*ex)
    out_ref[...] = xr_exp * jnp.tile(p, (1, n_ch))


def fold_gcc_spatial_params(w1, b1, w2, b2, *, n_ch):
    """One-time (init-time) parameter folding -- hoisted out of the per-call path.

    torch nn.Linear layout: w1 (FC2, FC1), b1 (FC2,), w2 (ex, FC2+cam), b2 (ex,).
    Exact refactor (no nonlinearity between FC1 and FC2):
      h2 = pooled @ (W1^T W2a^T) + cam @ W2b^T + (b1 W2a^T + b2)
    """
    sz_FC2 = w1.shape[0]
    sz_ex = w2.shape[0]
    w2t = jnp.asarray(w2, jnp.float32).T                        # (FC2+cam, ex)
    w2aT, w2bT = w2t[:sz_FC2, :], w2t[sz_FC2:, :]
    w12 = jnp.asarray(w1, jnp.float32).T @ w2aT                 # (FC1, ex)
    bias = (jnp.asarray(b1, jnp.float32) @ w2aT
            + jnp.asarray(b2, jnp.float32))[None, :]            # (1, ex)
    expand = jnp.repeat(jnp.eye(n_ch, dtype=jnp.float32), sz_ex, axis=1)  # (C, C*ex)
    return {"w12": w12, "wcam": w2bT, "bias": bias, "expand": expand}


def gcc_spatial_forward(x_ref, x, cam, folded, *, sz_sp):
    """Per-call wrapper: only free (contiguous) reshapes, then one pallas_call.

    x_ref : (B, C, 1, 1) float32
    x     : (B, H, W)    float32, with H * (W // 2) == sz_FC1
    cam   : (B, 1, sz_cam) float32, or None
    folded: output of fold_gcc_spatial_params (computed once, not per call)
    """
    B, H, W = x.shape
    C = x_ref.shape[1]
    w12, bias, expand = folded["w12"], folded["bias"], folded["expand"]
    sz_FC1, sz_ex = w12.shape
    assert H * (W // 2) == sz_FC1
    assert sz_sp * sz_sp == sz_ex
    assert expand.shape == (C, C * sz_ex)

    has_cam = cam is not None

    # Pure layout plumbing (contiguous reshapes -> bitcasts, no extra fusions).
    x3 = x.reshape(B, sz_FC1, 2)                 # pooled pairs on the last dim
    xr2 = x_ref.reshape(B, C)
    if has_cam:
        cam2 = cam.reshape(B, cam.shape[-1]).astype(jnp.float32)
        args = (x3, cam2, xr2, w12, folded["wcam"], bias, expand)
    else:
        # cam is None: drop the cam operand and W2b rows entirely (no zeros-fill).
        args = (x3, xr2, w12, bias, expand)

    # Advisory cost estimate so XLA schedules this tiny call sensibly when it
    # is embedded in a larger jit.
    sz_cam = folded["wcam"].shape[0]
    flops = (2 * B * sz_FC1 * sz_ex
             + (2 * B * sz_cam * sz_ex if has_cam else 0)
             + 2 * B * C * (C * sz_ex)
             + 15 * B * sz_ex)
    bytes_accessed = 4 * (sum(a.size for a in args) + B * C * sz_ex)
    cost = pl.CostEstimate(flops=flops,
                           transcendentals=B * sz_ex + B + 1,
                           bytes_accessed=bytes_accessed)

    vmem = pl.BlockSpec(memory_space=pltpu.MemorySpace.VMEM)
    kernel = functools.partial(_gcc_spatial_kernel, has_cam=has_cam, n_ch=C)
    out2d = pl.pallas_call(
        kernel,
        out_shape=jax.ShapeDtypeStruct((B, C * sz_ex), jnp.float32),
        in_specs=[vmem] * len(args),
        out_specs=vmem,
        cost_estimate=cost,
    )(*args)

    # rearrange 'b (c h w) -> b c h w' (free reshape)
    return out2d.reshape(B, C, sz_sp, sz_sp)


def _reference_forward(x_ref, x, cam, params, *, sz_sp):
    """Pure-JAX reference mirroring the PyTorch code line by line."""
    w1, b1, w2, b2 = params
    B, H, W = x.shape
    cam2 = jnp.squeeze(cam, axis=1).astype(jnp.float32)
    # max_pool2d(x, (1,2), (1,2)) on a 3-D tensor pools the last two dims
    xp = jnp.max(x.reshape(B, H, W // 2, 2), axis=-1)
    xf = xp.reshape(B, H * (W // 2))
    h1 = xf @ w1.T + b1
    h2 = jnp.concatenate([h1, cam2], axis=-1) @ w2.T + b2
    mean = jnp.mean(h2)
    var = jnp.mean((h2 - mean) ** 2)
    hn = (h2 - mean) / jnp.sqrt(var + 1e-5)
    p = jax.nn.softmax(hn, axis=-1)[:, None, :]            # (B, 1, sz_ex)
    xr = jnp.squeeze(x_ref, axis=-1)                       # (B, C, 1)
    out = jnp.einsum('bck,bke->bce', xr, p)
    return out.reshape(B, xr.shape[1], sz_sp, sz_sp)


if __name__ == "__main__":
    # Small, self-consistent sizes (module constructed as
    # gcc_spatial(sz_FC1=32, sz_FC=16, sz_cam=11, sz_ex=16) -> sz_sp=4).
    B, C = 2, 4
    H, W = 4, 16                     # H * (W // 2) == 32 == sz_FC1
    sz_FC1, sz_FC2, sz_cam = 32, 16, 11
    sz_ex, sz_sp = 16, 4

    key = jax.random.PRNGKey(0)
    k_x, k_xr, k_cam, k_w1, k_b1, k_w2, k_b2 = jax.random.split(key, 7)

    x = jax.random.normal(k_x, (B, H, W), jnp.float32)
    x_ref_in = jax.random.normal(k_xr, (B, C, 1, 1), jnp.float32)
    cam = jax.random.normal(k_cam, (B, 1, sz_cam), jnp.float32)

    # Deterministic synthetic parameters (torch nn.Linear layout: (out, in)).
    w1 = jax.random.normal(k_w1, (sz_FC2, sz_FC1), jnp.float32) * 0.1
    b1 = jax.random.normal(k_b1, (sz_FC2,), jnp.float32) * 0.1
    w2 = jax.random.normal(k_w2, (sz_ex, sz_FC2 + sz_cam), jnp.float32) * 0.1
    b2 = jax.random.normal(k_b2, (sz_ex,), jnp.float32) * 0.1
    params = (w1, b1, w2, b2)

    # Hoisted, once-per-parameter-change folding (review item 1).
    folded = fold_gcc_spatial_params(w1, b1, w2, b2, n_ch=C)

    fwd = jax.jit(functools.partial(gcc_spatial_forward, sz_sp=sz_sp))

    # --- main path (cam provided) ---------------------------------------------
    out = jax.block_until_ready(fwd(x_ref_in, x, cam, folded))
    ref = _reference_forward(x_ref_in, x, cam, params, sz_sp=sz_sp)
    assert out.shape == (B, C, sz_sp, sz_sp)
    np.testing.assert_allclose(np.asarray(out), np.asarray(ref),
                               rtol=1e-4, atol=1e-5)

    # --- cam is None path (W2b rows dropped entirely, review item 6) ----------
    out_nc = jax.block_until_ready(fwd(x_ref_in, x, None, folded))
    ref_nc = _reference_forward(x_ref_in, x,
                                jnp.zeros((B, 1, sz_cam), jnp.float32),
                                params, sz_sp=sz_sp)
    np.testing.assert_allclose(np.asarray(out_nc), np.asarray(ref_nc),
                               rtol=1e-4, atol=1e-5)

    print("KERNEL_OK")
</pallas_src>

<mosaic_0001>
module attributes {stable_mosaic.version = 11 : i64} {
  func.func @_gcc_spatial_kernel(%arg0: memref<2x32x2xf32, #tpu.memory_space<vmem>>, %arg1: memref<2x11xf32, #tpu.memory_space<vmem>>, %arg2: memref<2x4xf32, #tpu.memory_space<vmem>>, %arg3: memref<32x16xf32, #tpu.memory_space<vmem>>, %arg4: memref<11x16xf32, #tpu.memory_space<vmem>>, %arg5: memref<1x16xf32, #tpu.memory_space<vmem>>, %arg6: memref<4x64xf32, #tpu.memory_space<vmem>>, %arg7: memref<2x64xf32, #tpu.memory_space<vmem>>) attributes {dimension_semantics = [], scalar_prefetch = 0 : i64, scratch_operands = 0 : i64, tpu.core_type = #tpu.core_type<tc>} {
    %c0 = arith.constant 0 : index
    %c0_0 = arith.constant 0 : index
    %c0_1 = arith.constant 0 : index
    %0 = vector.load %arg0[%c0, %c0_0, %c0_1] : memref<2x32x2xf32, #tpu.memory_space<vmem>>, vector<2x32x2xf32>
    %cst = arith.constant dense<0xFF800000> : vector<2x32xf32>
    %1 = vector.multi_reduction <maximumf>, %0, %cst [2] : vector<2x32x2xf32> to vector<2x32xf32>
    %c0_2 = arith.constant 0 : index
    %c0_3 = arith.constant 0 : index
    %2 = vector.load %arg3[%c0_2, %c0_3] : memref<32x16xf32, #tpu.memory_space<vmem>>, vector<32x16xf32>
    %cst_4 = arith.constant dense<0.000000e+00> : vector<2x16xf32>
    %3 = tpu.matmul %1, %2, %cst_4 {dimension_numbers = #tpu.dot_dimension_numbers<[1], [0], [0], [1], [0, 0, 1, 1], [], []>} : vector<2x32xf32>, vector<32x16xf32>, vector<2x16xf32> -> vector<2x16xf32>
    %c0_5 = arith.constant 0 : index
    %c0_6 = arith.constant 0 : index
    %4 = vector.load %arg1[%c0_5, %c0_6] : memref<2x11xf32, #tpu.memory_space<vmem>>, vector<2x11xf32>
    %c0_7 = arith.constant 0 : index
    %c0_8 = arith.constant 0 : index
    %5 = vector.load %arg4[%c0_7, %c0_8] : memref<11x16xf32, #tpu.memory_space<vmem>>, vector<11x16xf32>
    %cst_9 = arith.constant dense<0.000000e+00> : vector<2x16xf32>
    %6 = tpu.matmul %4, %5, %cst_9 {dimension_numbers = #tpu.dot_dimension_numbers<[1], [0], [0], [1], [0, 0, 1, 1], [], []>} : vector<2x11xf32>, vector<11x16xf32>, vector<2x16xf32> -> vector<2x16xf32>
    %7 = arith.addf %3, %6 : vector<2x16xf32>
    %c0_10 = arith.constant 0 : index
    %c0_11 = arith.constant 0 : index
    %8 = vector.load %arg5[%c0_10, %c0_11] : memref<1x16xf32, #tpu.memory_space<vmem>>, vector<1x16xf32>
    %9 = vector.broadcast %8 : vector<1x16xf32> to vector<2x16xf32>
    %10 = arith.addf %7, %9 : vector<2x16xf32>
    %11 = vector.shape_cast %10 : vector<2x16xf32> to vector<1x2x16xf32>
    %cst_12 = arith.constant dense<0.000000e+00> : vector<1xf32>
    %12 = vector.multi_reduction <add>, %11, %cst_12 [1, 2] : vector<1x2x16xf32> to vector<1xf32>
    %13 = vector.shape_cast %12 : vector<1xf32> to vector<1x1x1xf32>
    %14 = vector.extract %13[0, 0, 0] : f32 from vector<1x1x1xf32>
    %cst_13 = arith.constant 3.200000e+01 : f32
    %15 = arith.divf %14, %cst_13 : f32
    %16 = vector.broadcast %15 : f32 to vector<2x16xf32>
    %17 = arith.subf %10, %16 : vector<2x16xf32>
    %18 = arith.mulf %17, %17 : vector<2x16xf32>
    %19 = vector.shape_cast %18 : vector<2x16xf32> to vector<1x2x16xf32>
    %cst_14 = arith.constant dense<0.000000e+00> : vector<1xf32>
    %20 = vector.multi_reduction <add>, %19, %cst_14 [1, 2] : vector<1x2x16xf32> to vector<1xf32>
    %21 = vector.shape_cast %20 : vector<1xf32> to vector<1x1x1xf32>
    %22 = vector.extract %21[0, 0, 0] : f32 from vector<1x1x1xf32>
    %cst_15 = arith.constant 3.200000e+01 : f32
    %23 = arith.divf %22, %cst_15 : f32
    %24 = vector.broadcast %15 : f32 to vector<2x16xf32>
    %25 = arith.subf %10, %24 : vector<2x16xf32>
    %cst_16 = arith.constant 9.99999974E-6 : f32
    %26 = arith.addf %23, %cst_16 : f32
    %27 = math.rsqrt %26 : f32
    %28 = vector.broadcast %27 : f32 to vector<2x16xf32>
    %29 = arith.mulf %25, %28 : vector<2x16xf32>
    %cst_17 = arith.constant dense<0xFF800000> : vector<2xf32>
    %30 = vector.multi_reduction <maximumf>, %29, %cst_17 [1] : vector<2x16xf32> to vector<2xf32>
    %31 = vector.shape_cast %30 : vector<2xf32> to vector<2x1xf32>
    %32 = vector.broadcast %31 : vector<2x1xf32> to vector<2x16xf32>
    %33 = arith.subf %29, %32 : vector<2x16xf32>
    %34 = math.exp %33 : vector<2x16xf32>
    %cst_18 = arith.constant dense<0.000000e+00> : vector<2xf32>
    %35 = vector.multi_reduction <add>, %34, %cst_18 [1] : vector<2x16xf32> to vector<2xf32>
    %36 = vector.shape_cast %35 : vector<2xf32> to vector<2x1xf32>
    %37 = tpu.reciprocal %36 : vector<2x1xf32> -> vector<2x1xf32>
    %38 = vector.broadcast %37 : vector<2x1xf32> to vector<2x16xf32>
    %39 = arith.mulf %34, %38 : vector<2x16xf32>
    %c0_19 = arith.constant 0 : index
    %c0_20 = arith.constant 0 : index
    %40 = vector.load %arg2[%c0_19, %c0_20] : memref<2x4xf32, #tpu.memory_space<vmem>>, vector<2x4xf32>
    %c0_21 = arith.constant 0 : index
    %c0_22 = arith.constant 0 : index
    %41 = vector.load %arg6[%c0_21, %c0_22] : memref<4x64xf32, #tpu.memory_space<vmem>>, vector<4x64xf32>
    %cst_23 = arith.constant dense<0.000000e+00> : vector<2x64xf32>
    %42 = tpu.matmul %40, %41, %cst_23 {dimension_numbers = #tpu.dot_dimension_numbers<[1], [0], [0], [1], [0, 0, 1, 1], [], []>} : vector<2x4xf32>, vector<4x64xf32>, vector<2x64xf32> -> vector<2x64xf32>
    %43 = tpu.concatenate %39, %39, %39, %39 in 1 : vector<2x16xf32>, vector<2x16xf32>, vector<2x16xf32>, vector<2x16xf32> -> vector<2x64xf32>
    %44 = arith.mulf %42, %43 : vector<2x64xf32>
    %c0_24 = arith.constant 0 : index
    %c0_25 = arith.constant 0 : index
    %45 = vector.load %arg7[%c0_24, %c0_25] : memref<2x64xf32, #tpu.memory_space<vmem>>, vector<2x64xf32>
    tpu.vector_store %arg7[%c0_24, %c0_25], %44 {strides = array<i32>} : memref<2x64xf32, #tpu.memory_space<vmem>>, vector<2x64xf32>,
    return
  }
}

</mosaic_0001>

<bundles_post_ra>
// kernel: gcc_spatial_forward.1
= control target key start
LH: loop header
LB: loop body
LE: loop exit
PB: predicated region body
PF: predicated region fallthrough
CT: control target
= control target key end

     0   :  { %vm34_vm0 = vcmask 15360   ;;  %v486_v16 = vmov 0.0   ;;  %vm70_vm1 = vcmask 1042432   ;;  %vm487_vm2 = vmmov 0   ;;  %s489_s15 = smov 16   ;;  %s602_s0 = inlined_call_operand.vmem [shape: f32[2,32,2], index: 0, kind: input, shape index: {}]   ;;  %s603_s3 = inlined_call_operand.vmem [shape: f32[32,16], index: 3, kind: input, shape index: {}]   ;;  %s604_s4 = inlined_call_operand.vmem [shape: f32[11,16], index: 4, kind: input, shape index: {}]   ;;  %s605_s1 = inlined_call_operand.vmem [shape: f32[2,11], index: 1, kind: input, shape index: {}]   ;;  %s606_s5 = inlined_call_operand.vmem [shape: f32[1,16], index: 5, kind: input, shape index: {}]   ;;  %s607_s6 = inlined_call_operand.vmem [shape: f32[4,64], index: 6, kind: input, shape index: {}]   ;;  %s608_s2 = inlined_call_operand.vmem [shape: f32[2,4], index: 2, kind: input, shape index: {}]   ;;  %s609_s7 = inlined_call_operand.vmem [shape: f32[2,64], index: 7, kind: output, shape index: {}]  }
   0x1   :  { %v30_v0 = vld [vmem:[%s602_s0 + $0x20] sm:$0xff]  ;;  %v31_v2 = vld [vmem:[%s602_s0 + $0x28] sm:$0xff]  ;;  %v32_v8 = vld [vmem:[%s602_s0 + $0x30] sm:$0xff]  ;;  %453 = vmatprep.subr.mxu1 %v486_v16  ;;  %446 = vmatprep.subr.mxu0 %v486_v16  ;;  %vm66_vm3 = vcmask 89088   ;;  %v152_v24 = vlaneseq  ;;  %vm163_vm4 = vcmask 130112   ;;  %vm170_vm5 = vcmask 195712  }
   0x2   :  { %v26_v1 = vld [vmem:[%s602_s0] sm:$0xff]  ;;  %v47_v3 = vsel %vm34_vm0, %v30_v0, -inf  ;;  %v27_v5 = vld [vmem:[%s602_s0 + $0x8] sm:$0xff]  ;;  %v50_v6 = vsel %vm34_vm0, %v31_v2, -inf  ;;  %v28_v9 = vld [vmem:[%s602_s0 + $0x10] sm:$0xff]  ;;  %v53_v10 = vsel %vm34_vm0, %v32_v8, -inf  ;;  %450 = vmatprep.mubr.msk.f32.mxu0 %vm487_vm2, %v486_v16  ;;  %461 = vmatprep.mubr.msk.f32.mxu1 %vm487_vm2, %v486_v16 }
   0x3   :  { %v35_v4 = vsel %vm34_vm0, %v26_v1, -inf  ;;  %48 = vmax.xlane.f32.xlu1 %v47_v3  ;;  %v38_v7 = vsel %vm34_vm0, %v27_v5, -inf  ;;  %v41_v11 = vsel %vm34_vm0, %v28_v9, -inf  ;;  %v33_v12 = vld [vmem:[%s602_s0 + $0x38] sm:$0xff]  ;;  %v65_v18 = vld [vmem:[%s604_s4 + $0x8] sm:$0x7] }
   0x4   :  { %36 = vmax.xlane.f32.xlu0 %v35_v4  ;;  %v29_v13 = vld [vmem:[%s602_s0 + $0x18] sm:$0xff]  ;;  %v56_v14 = vsel %vm34_vm0, %v33_v12, -inf  ;;  %v61_v19 = vld [vmem:[%s603_s3 + $0x10] sm:$0xff]  ;;  %447 = vmatpush3.msk.msra.mxu0 %vm70_vm1, %v65_v18  ;;  %v64_v20 = vld [vmem:[%s604_s4] sm:$0xff]  ;;  %v153_v25 = vand.u32 127, %v152_v24  ;;  %v155_v30 = vshrl.u32 %v152_v24, 7 }
   0x5   :  { %v44_v15 = vsel %vm34_vm0, %v29_v13, -inf  ;;  %v62_v17 = vld [vmem:[%s603_s3 + $0x18] sm:$0xff]  ;;  %448 = vmatprep.subr.mxu0 %v486_v16  ;;  %v60_v21 = vld [vmem:[%s603_s3 + $0x8] sm:$0xff]  ;;  %v63_v22 = vld [vmem:[%s605_s1] sm:$0x3]  ;;  %vm177_vm6 = vcmask 261312  }
   0x6   :  { %454 = vmatpush3.msra.mxu1 %v62_v17  ;;  %449 = vmatpush3.msra.mxu0 %v64_v20  ;;  %v59_v23 = vld [vmem:[%s603_s3] sm:$0xff]  ;;  %v158_v28 = vadd.s32 4294967288, %v153_v25  ;;  %v165_v29 = vadd.s32 4294967280, %v153_v25  ;;  %v172_v34 = vadd.s32 4294967272, %v153_v25  ;;  %v156_v36 = vsub.s32 %v153_v25, %v155_v30 }
   0x7   :  { %51 = vmax.xlane.f32.xlu1 %v50_v6  ;;  %455 = vmatprep.subr.mxu1 %v486_v16  ;;  %vm198_vm7 = vcmask 1041409   ;;  %vm200_vm8 = vcmask 261120   ;;  %v433_v60 = vld [vmem:[%s606_s5] ss:$0 sm:$0xff]  ;;  %vm281_vm9 = vcmask 123904   ;;  %vm334_vm10 = vcmask 1043456  }
   0x8   :  { %39 = vmax.xlane.f32.xlu0 %v38_v7  ;;  %456 = vmatpush3.msra.mxu1 %v61_v19  ;;  %v161_v33 = vsub.s32 %v158_v28, %v155_v30  ;;  %v168_v35 = vsub.s32 %v165_v29, %v155_v30  ;;  %v175_v41 = vsub.s32 %v172_v34, %v155_v30  ;;  %vm330_vm11 = vcmask 31744   ;;  %v329_v24 = vld [vmem:[%s607_s6] sm:$0xf]  ;;  %s488_s6 = smov 32  }
   0x9   :  { %457 = vmatprep.subr.mxu1 %v486_v16  ;;  %451 = vmatmul.mubr.msk.f32.vlgmr.msra.gmra.mxu0 %vm66_vm3, %v63_v22  ;;  %v328_v25 = vld [vmem:[%s608_s2] sm:$0x3]  ;;  %s490_s2 = smov 48   ;;  %vm418_vm12 = vcmask 130048   ;;  %vm421_vm13 = vcmask 392192   ;;  %vm424_vm14 = vcmask 517120  }
   0xa   :  { %458 = vmatpush3.msra.mxu1 %v60_v21  ;;  %464 = vmatprep.subr.mxu0 %v486_v16 }
   0xb   :  { %54 = vmax.xlane.f32.xlu1 %v53_v10  ;;  %459 = vmatprep.subr.mxu1 %v486_v16 }
   0xc   :  { %42 = vmax.xlane.f32.xlu0 %v41_v11  ;;  %460 = vmatpush3.msra.mxu1 %v59_v23 }
   0xd   :  { %466 = vmatprep.mubr.msk.f32.mxu0 %vm487_vm2, %v486_v16  ;;  %465 = vmatpush3.msk.msra.mxu0 %vm334_vm10, %v329_v24 }
   0xe   :  { %467 = vmatmul.mubr.msk.f32.vlgmr.msra.gmra.mxu0 %vm330_vm11, %v328_v25 }
   0xf   :  { %57 = vmax.xlane.f32.xlu1 %v56_v14 }
  0x10   :  { %45 = vmax.xlane.f32.xlu0 %v44_v15 }
  0x8c   :  { %v49_v26 = vpop.xlane.xlu1 %48 }
  0x8d   :  { %v37_v27 = vpop.xlane.xlu0 %36  ;;  %v182_v44 = vrot.slane %v49_v26, %v156_v36 }
  0x8e   :  { %v157_v45 = vrot.slane %v37_v27, %v156_v36 }
  0x90   :  { %v52_v31 = vpop.xlane.xlu1 %51 }
  0x91   :  { %v40_v32 = vpop.xlane.xlu0 %39  ;;  %v186_v39 = vrot.slane %v52_v31, %v161_v33 }
  0x92   :  { %v162_v40 = vrot.slane %v40_v32, %v161_v33 }
  0x93   :  { %v187_v48 = vsel %vm163_vm4, %v186_v39, %v182_v44 }
  0x94   :  { %v55_v37 = vpop.xlane.xlu1 %54  ;;  %v164_v49 = vsel %vm163_vm4, %v162_v40, %v157_v45 }
  0x95   :  { %v43_v38 = vpop.xlane.xlu0 %42  ;;  %v191_v42 = vrot.slane %v55_v37, %v168_v35 }
  0x96   :  { %v169_v43 = vrot.slane %v43_v38, %v168_v35 }
  0x97   :  { %v192_v52 = vsel %vm170_vm5, %v191_v42, %v187_v48 }
  0x98   :  { %v58_v46 = vpop.xlane.xlu1 %57  ;;  %v171_v53 = vsel %vm170_vm5, %v169_v43, %v164_v49 }
  0x99   :  { %v46_v47 = vpop.xlane.xlu0 %45  ;;  %v196_v50 = vrot.slane %v58_v46, %v175_v41 }
  0x9a   :  { %v176_v51 = vrot.slane %v46_v47, %v175_v41 }
  0x9b   :  { %v197_v54 = vsel %vm177_vm6, %v196_v50, %v192_v52 }
  0x9c   :  { %v178_v55 = vsel %vm177_vm6, %v176_v51, %v171_v53 }
  0x9d   :  { %v199_v56 = vsel %vm198_vm7, %v197_v54, %v178_v55 }
  0x9e   :  { %462 = vmatmul.mubr.msk.f32.vlgmr.msra.gmra.mxu1 %vm200_vm8, %v199_v56 }
  0xc9   :  { %v140_v57 = vpop.f32.mrf.mxu0 }
  0xcb   :  { %v452_v58 = vpop.f32.mrf.mxu0 }
  0xce   :  { %v404_v32 = vpop.f32.mrf.mxu0 }
  0xd0   :  { %v468_v33 = vpop.f32.mrf.mxu0 }
 0x15e   :  { %v269_v59 = vpop.f32.mrf.mxu1 }
 0x15f   :  { %v270_v61 = vadd.f32 %v269_v59, %v140_v57 }
 0x160   :  { %v463_v62 = vpop.f32.mrf.mxu1 }
 0x161   :  { %v280_v63 = vadd.f32 %v433_v60, %v270_v61 }
 0x163   :  { %v282_v0 = vsel %vm281_vm9, %v280_v63, 0.0 }
 0x164   :  { %283 = vadd.xlane.f32.xlu0 %v282_v0 }
 0x1ed   :  { %v284_v1 = vpop.xlane.xlu0 %283 }
 0x1ee   :  { %v285_v2 = vrot.slane %v284_v1, 4 }
 0x1f0   :  { %v286_v3 = vadd.f32 %v285_v2, %v284_v1 }
 0x1f2   :  { %v287_v4 = vrot.slane %v286_v3, 2 }
 0x1f4   :  { %v288_v5 = vadd.f32 %v287_v4, %v286_v3 }
 0x1f6   :  { %v289_v6 = vrot.slane %v288_v5, 1 }
 0x1f8   :  { %v290_v7 = vadd.f32 %v289_v6, %v288_v5 }
 0x1fa   :  { %469 = vpush %v290_v7 }
 0x22b   :  { %s470_s4 = spop %469 }
 0x22c   :  { %s294_s30 = smul.f32 0.03125, %s470_s4 }
 0x22e   :  { %v295_v8 = vstv %s294_s30 }
 0x22f   :  { %v296_v9 = vsub.f32 %v280_v63, %v295_v8 }
 0x231   :  { %v297_v10 = vmul.f32 %v296_v9, %v296_v9 }
 0x233   :  { %v298_v11 = vsel %vm281_vm9, %v297_v10, 0.0 }
 0x234   :  { %299 = vadd.xlane.f32.xlu1 %v298_v11 }
 0x2bd   :  { %v300_v12 = vpop.xlane.xlu1 %299 }
 0x2be   :  { %v301_v13 = vrot.slane %v300_v12, 4 }
 0x2c0   :  { %v302_v14 = vadd.f32 %v301_v13, %v300_v12 }
 0x2c2   :  { %v303_v15 = vrot.slane %v302_v14, 2 }
 0x2c4   :  { %v304_v16 = vadd.f32 %v303_v15, %v302_v14 }
 0x2c6   :  { %v305_v17 = vrot.slane %v304_v16, 1 }
 0x2c8   :  { %v306_v18 = vadd.f32 %v305_v17, %v304_v16 }
 0x2ca   :  { %471 = vpush %v306_v18 }
 0x2fb   :  { %s472_s5 = spop %471 }
 0x2fc   :  { %s310_s8 = smul.f32 0.03125, %s472_s5 }
 0x2fe   :  { %s311_s9 = sadd.f32 1e-05, %s310_s8 }
 0x300   :  { %v312_v19 = vstv %s311_s9 }
 0x301   :  { %480 = vrsqrt.f32 %v312_v19 }
 0x30e   :  { %v481_v20 = vpop.eup %480 }
 0x30f   :  { %473 = vpush %v481_v20 }
 0x340   :  { %s474_s10 = spop %473 }
 0x341   :  { %v315_v21 = vstv %s474_s10 }
 0x342   :  { %v316_v22 = vmul.f32 %v315_v21, %v296_v9 }
 0x344   :  { %v317_v23 = vsel %vm281_vm9, %v316_v22, -inf }
 0x345   :  { %318 = vmax.xlane.f32.xlu0 %v317_v23 }
 0x3ce   :  { %v319_v26 = vpop.xlane.xlu0 %318 }
 0x3cf   :  { %v320_v27 = vsub.f32 %v316_v22, %v319_v26 }
 0x3d1   :  { %v321_v28 = vmul.f32 1.442695, %v320_v27 }
 0x3d3   :  { %482 = vpow2.f32 %v321_v28 }
 0x3e0   :  { %v483_v29 = vpop.eup %482 }
 0x3e1   :  { %v323_v30 = vsel %vm281_vm9, %v483_v29, 0.0 }
 0x3e2   :  { %324 = vadd.xlane.f32.xlu1 %v323_v30 }
 0x46b   :  { %v325_v31 = vpop.xlane.xlu1 %324 }
 0x46c   :  { %484 = vrcp.f32 %v325_v31 }
 0x479   :  { %v485_v34 = vpop.eup %484 }
 0x47a   :  { %v327_v35 = vmul.f32 %v485_v34, %v483_v29 }
 0x47c   :  { %412 = vrot.lane.b32.xlu1 %v327_v35, %s488_s6  ;;  %409 = vrot.lane.b32.xlu0 %v327_v35, %s489_s15 }
 0x480   :  { %415 = vrot.lane.b32.xlu1 %v327_v35, %s490_s2 }
 0x4ee   :  { %v413_v36 = vpop.permute.xlu1 %412  ;;  %v410_v37 = vpop.permute.xlu0 %409 }
 0x4ef   :  { %v419_v38 = vsel %vm418_vm12, %v327_v35, %v410_v37 }
 0x4f0   :  { %v420_v40 = vsel %vm200_vm8, %v419_v38, %v413_v36 }
 0x4f2   :  { %v416_v39 = vpop.permute.xlu1 %415 }
 0x4f3   :  { %v422_v41 = vsel %vm421_vm13, %v420_v40, %v416_v39 }
 0x4f4   :  { %v423_v42 = vmul.f32 %v422_v41, %v404_v32 }
 0x4f6   :  { %425 = vst.msk [vmem:[%s609_s7] sm:$0x3] %vm424_vm14, %v423_v42 }

</bundles_post_ra>
